<compile_context>
chip_gen: v6e
topology: v6e:2x2x1
jax: 0.10.0
libtpu: 0.0.40
codegen_flags: <defaults>
</compile_context>

<pallas_src>
import math

import jax
import jax.numpy as jnp
from jax.experimental import pallas as pl
from jax.experimental.pallas import tpu as pltpu


def _round_up(n, m):
    return ((n + m - 1) // m) * m


# ----------------------------------------------------------------------------
# Kernel
# ----------------------------------------------------------------------------
def _mlp_kernel(*refs):
    """Whole-MLP hot path for one row tile.

    refs = (x_ref, w0_ref, b0_ref, w1_ref, b1_ref, ..., o_ref)
    Matmuls on the MXU (f32 accumulate), Tanh between hidden layers,
    no activation after the final Linear (matches the torch module).
    Weights/biases are used at their native dtype.
    """
    x_ref = refs[0]
    o_ref = refs[-1]
    params = refs[1:-1]
    n_layers = len(params) // 2

    h = x_ref[...]
    for i in range(n_layers):  # unrolled at trace time (static layer count)
        w = params[2 * i][...]
        b = params[2 * i + 1][...]
        h = jnp.dot(h, w, preferred_element_type=jnp.float32) + b
        if i < n_layers - 1:
            h = jnp.tanh(h)
    o_ref[...] = h.astype(o_ref.dtype)


# ----------------------------------------------------------------------------
# pallas_call wrapper
# ----------------------------------------------------------------------------
def _choose_tile(n, tile_n):
    """Row tile: multiple of 8 sublanes, capped so the grid has >=2 steps
    whenever possible (v7x megacore sharding via dimension_semantics)."""
    cap = _round_up(pl.cdiv(n, 2), 8)
    return max(8, min(tile_n, cap))


def _mlp_forward(x, params, out_dtype, tile_n=8192):
    N, L_in = x.shape
    L_out = params[-1].shape[-1]

    tile_n = _choose_tile(N, tile_n)
    grid = (pl.cdiv(N, tile_n),)  # ragged last block handled by Pallas masking

    # x / out stream per row tile; weights & biases are VMEM-resident
    # (constant index_map -> same block every grid step).
    in_specs = [pl.BlockSpec((tile_n, L_in), lambda i: (i, 0))]
    for p in params:
        in_specs.append(pl.BlockSpec(p.shape, lambda i: (0, 0)))
    out_spec = pl.BlockSpec((tile_n, L_out), lambda i: (i, 0))

    x_item = jnp.dtype(x.dtype).itemsize
    o_item = jnp.dtype(out_dtype).itemsize
    param_bytes = sum(p.size * jnp.dtype(p.dtype).itemsize for p in params)
    w_list = params[0::2]
    cost = pl.CostEstimate(
        flops=2 * N * sum(w.shape[0] * w.shape[1] for w in w_list),
        transcendentals=N * sum(w.shape[1] for w in w_list[:-1]),
        bytes_accessed=N * L_in * x_item + N * L_out * o_item + param_bytes,
    )

    # Double-buffered VMEM footprint; only override the scoped-VMEM limit when
    # we would approach v5e's 16 MiB default (huge tile_n).
    needed = 2 * tile_n * (L_in * x_item + L_out * o_item) + 2 * param_bytes
    vmem_limit = None
    if needed > 12 * (1 << 20):
        vmem_limit = int(min(2 * needed + (1 << 20), 100 * (1 << 20)))

    return pl.pallas_call(
        _mlp_kernel,
        out_shape=jax.ShapeDtypeStruct((N, L_out), out_dtype),
        grid=grid,
        in_specs=in_specs,
        out_specs=out_spec,
        compiler_params=pltpu.CompilerParams(
            dimension_semantics=("parallel",),
            vmem_limit_bytes=vmem_limit),
        cost_estimate=cost,
    )(x, *params)


# ----------------------------------------------------------------------------
# Module
# ----------------------------------------------------------------------------
class ParameterPredictor:
    """JAX/Pallas port of nff.nn.modules.ParameterPredictor."""

    def __init__(self, L_in, L_hidden, L_out, trainable=False, key=None,
                 tile_n=8192, stream_dtype=None):
        self.L_out = L_out
        self.trainable = trainable
        self.tile_n = tile_n
        self.stream_dtype = stream_dtype  # e.g. jnp.bfloat16 to halve x HBM traffic
        self.params = []
        if trainable:
            dims = [L_in] + list(L_hidden) + [L_out]
            key = jax.random.PRNGKey(42) if key is None else key
            for din, dout in zip(dims[:-1], dims[1:]):
                key, kw, kb = jax.random.split(key, 3)
                bound = 1.0 / math.sqrt(din)  # torch.nn.Linear default init range
                # W stored as (in, out) so the kernel does y = x @ W + b
                # (== torch's x @ W_t.T + b).  Bias kept 2-D (1, out).
                w = jax.random.uniform(kw, (din, dout), jnp.float32, -bound, bound)
                b = jax.random.uniform(kb, (1, dout), jnp.float32, -bound, bound)
                self.params += [w, b]

    def __call__(self, x):
        if not self.trainable:
            # ZeroNet: pure zeros of shape (len(x), L_out); no kernel launch --
            # XLA fuses the broadcast-zero into any consumer for free.
            return jnp.zeros((x.shape[0], self.L_out), x.dtype)

        out_dtype = x.dtype
        if self.stream_dtype is not None and x.dtype != self.stream_dtype:
            x = x.astype(self.stream_dtype)  # f32 accumulation inside the kernel
        return _mlp_forward(x, self.params, out_dtype, tile_n=self.tile_n)


# ----------------------------------------------------------------------------
# Pure-JAX reference (for verification only)
# ----------------------------------------------------------------------------
def _reference(x, params, trainable, L_out):
    if not trainable:
        return jnp.zeros((x.shape[0], L_out), x.dtype)
    h = x.astype(jnp.float32)
    n_layers = len(params) // 2
    for i in range(n_layers):
        h = h @ params[2 * i] + params[2 * i + 1]
        if i < n_layers - 1:
            h = jnp.tanh(h)
    return h


if __name__ == "__main__":
    key = jax.random.PRNGKey(0)
    L_in, L_hidden, L_out = 32, [32, 32], 16

    # --- trainable=True, single-block case ------------------------------------
    N = 8
    x = jax.random.normal(key, (N, L_in), dtype=jnp.float32)
    pp_train = ParameterPredictor(L_in, L_hidden, L_out, trainable=True)
    y = jax.block_until_ready(pp_train(x))
    y_ref = _reference(x, pp_train.params, True, L_out)
    assert y.shape == (N, L_out)
    assert jnp.allclose(y, y_ref, atol=1e-5, rtol=1e-5)

    # --- trainable=True, multi-step ragged grid (no wrapper pad/slice) --------
    N2 = 40
    x2 = jax.random.normal(jax.random.PRNGKey(1), (N2, L_in), dtype=jnp.float32)
    pp_tiled = ParameterPredictor(L_in, L_hidden, L_out, trainable=True, tile_n=16)
    y2 = jax.block_until_ready(pp_tiled(x2))
    y2_ref = _reference(x2, pp_tiled.params, True, L_out)
    assert y2.shape == (N2, L_out)
    assert jnp.allclose(y2, y2_ref, atol=1e-5, rtol=1e-5)

    # --- trainable=True, bf16 input streaming (f32 accumulate, f32 output) ----
    pp_bf16 = ParameterPredictor(L_in, L_hidden, L_out, trainable=True,
                                 stream_dtype=jnp.bfloat16)
    y3 = jax.block_until_ready(pp_bf16(x2))
    x2_q = x2.astype(jnp.bfloat16).astype(jnp.float32)  # same input quantization
    y3_ref = _reference(x2_q, pp_bf16.params, True, L_out)
    assert y3.shape == (N2, L_out) and y3.dtype == jnp.float32
    assert jnp.allclose(y3, y3_ref, atol=1e-3, rtol=1e-3)

    # --- trainable=False path (ZeroNet, no kernel launch) ---------------------
    pp_zero = ParameterPredictor(L_in, L_hidden, L_out, trainable=False)
    z = jax.block_until_ready(pp_zero(x))
    assert z.shape == (N, L_out)
    assert jnp.allclose(z, jnp.zeros((N, L_out), jnp.float32))

    print("KERNEL_OK")
</pallas_src>

<mosaic_0001>
module attributes {stable_mosaic.version = 11 : i64} {
  func.func @_mlp_kernel(%arg0: i32, %arg1: memref<8x32xf32, #tpu.memory_space<vmem>>, %arg2: memref<32x32xf32, #tpu.memory_space<vmem>>, %arg3: memref<1x32xf32, #tpu.memory_space<vmem>>, %arg4: memref<32x32xf32, #tpu.memory_space<vmem>>, %arg5: memref<1x32xf32, #tpu.memory_space<vmem>>, %arg6: memref<32x16xf32, #tpu.memory_space<vmem>>, %arg7: memref<1x16xf32, #tpu.memory_space<vmem>>, %arg8: memref<8x16xf32, #tpu.memory_space<vmem>>) attributes {dimension_semantics = [#tpu.dimension_semantics<parallel>], iteration_bounds = array<i64: 1>, scalar_prefetch = 0 : i64, scratch_operands = 0 : i64, tpu.core_type = #tpu.core_type<tc>, window_params = [{transform_indices = @transform_0, window_bounds = array<i64: 8, 32>}, {pipeline_mode = #tpu.pipeline_mode<synchronous>, transform_indices = @transform_1, window_bounds = array<i64: 32, 32>}, {pipeline_mode = #tpu.pipeline_mode<synchronous>, transform_indices = @transform_2, window_bounds = array<i64: 1, 32>}, {pipeline_mode = #tpu.pipeline_mode<synchronous>, transform_indices = @transform_3, window_bounds = array<i64: 32, 32>}, {pipeline_mode = #tpu.pipeline_mode<synchronous>, transform_indices = @transform_4, window_bounds = array<i64: 1, 32>}, {pipeline_mode = #tpu.pipeline_mode<synchronous>, transform_indices = @transform_5, window_bounds = array<i64: 32, 16>}, {pipeline_mode = #tpu.pipeline_mode<synchronous>, transform_indices = @transform_6, window_bounds = array<i64: 1, 16>}, {transform_indices = @transform_7, window_bounds = array<i64: 8, 16>}]} {
    %c0 = arith.constant 0 : index
    %c0_0 = arith.constant 0 : index
    %0 = vector.load %arg1[%c0, %c0_0] : memref<8x32xf32, #tpu.memory_space<vmem>>, vector<8x32xf32>
    %c0_1 = arith.constant 0 : index
    %c0_2 = arith.constant 0 : index
    %1 = vector.load %arg2[%c0_1, %c0_2] : memref<32x32xf32, #tpu.memory_space<vmem>>, vector<32x32xf32>
    %c0_3 = arith.constant 0 : index
    %c0_4 = arith.constant 0 : index
    %2 = vector.load %arg3[%c0_3, %c0_4] : memref<1x32xf32, #tpu.memory_space<vmem>>, vector<1x32xf32>
    %cst = arith.constant dense<0.000000e+00> : vector<8x32xf32>
    %3 = tpu.matmul %0, %1, %cst {dimension_numbers = #tpu.dot_dimension_numbers<[1], [0], [0], [1], [0, 0, 1, 1], [], []>} : vector<8x32xf32>, vector<32x32xf32>, vector<8x32xf32> -> vector<8x32xf32>
    %4 = vector.broadcast %2 : vector<1x32xf32> to vector<8x32xf32>
    %5 = arith.addf %3, %4 : vector<8x32xf32>
    %6 = math.tanh %5 : vector<8x32xf32>
    %c0_5 = arith.constant 0 : index
    %c0_6 = arith.constant 0 : index
    %7 = vector.load %arg4[%c0_5, %c0_6] : memref<32x32xf32, #tpu.memory_space<vmem>>, vector<32x32xf32>
    %c0_7 = arith.constant 0 : index
    %c0_8 = arith.constant 0 : index
    %8 = vector.load %arg5[%c0_7, %c0_8] : memref<1x32xf32, #tpu.memory_space<vmem>>, vector<1x32xf32>
    %cst_9 = arith.constant dense<0.000000e+00> : vector<8x32xf32>
    %9 = tpu.matmul %6, %7, %cst_9 {dimension_numbers = #tpu.dot_dimension_numbers<[1], [0], [0], [1], [0, 0, 1, 1], [], []>} : vector<8x32xf32>, vector<32x32xf32>, vector<8x32xf32> -> vector<8x32xf32>
    %10 = vector.broadcast %8 : vector<1x32xf32> to vector<8x32xf32>
    %11 = arith.addf %9, %10 : vector<8x32xf32>
    %12 = math.tanh %11 : vector<8x32xf32>
    %c0_10 = arith.constant 0 : index
    %c0_11 = arith.constant 0 : index
    %13 = vector.load %arg6[%c0_10, %c0_11] : memref<32x16xf32, #tpu.memory_space<vmem>>, vector<32x16xf32>
    %c0_12 = arith.constant 0 : index
    %c0_13 = arith.constant 0 : index
    %14 = vector.load %arg7[%c0_12, %c0_13] : memref<1x16xf32, #tpu.memory_space<vmem>>, vector<1x16xf32>
    %cst_14 = arith.constant dense<0.000000e+00> : vector<8x16xf32>
    %15 = tpu.matmul %12, %13, %cst_14 {dimension_numbers = #tpu.dot_dimension_numbers<[1], [0], [0], [1], [0, 0, 1, 1], [], []>} : vector<8x32xf32>, vector<32x16xf32>, vector<8x16xf32> -> vector<8x16xf32>
    %16 = vector.broadcast %14 : vector<1x16xf32> to vector<8x16xf32>
    %17 = arith.addf %15, %16 : vector<8x16xf32>
    %c0_15 = arith.constant 0 : index
    %c0_16 = arith.constant 0 : index
    %18 = vector.load %arg8[%c0_15, %c0_16] : memref<8x16xf32, #tpu.memory_space<vmem>>, vector<8x16xf32>
    tpu.vector_store %arg8[%c0_15, %c0_16], %17 {strides = array<i32>} : memref<8x16xf32, #tpu.memory_space<vmem>>, vector<8x16xf32>,
    return
  }
  func.func @transform_0(%arg0: i32) -> (i32, i32) {
    %c0_i32 = arith.constant 0 : i32
    %c0_i32_0 = arith.constant 0 : i32
    return %arg0, %c0_i32 : i32, i32
  }
  func.func @transform_1(%arg0: i32) -> (i32, i32) {
    %c0_i32 = arith.constant 0 : i32
    %c0_i32_0 = arith.constant 0 : i32
    %c0_i32_1 = arith.constant 0 : i32
    return %c0_i32, %c0_i32_0 : i32, i32
  }
  func.func @transform_2(%arg0: i32) -> (i32, i32) {
    %c0_i32 = arith.constant 0 : i32
    %c0_i32_0 = arith.constant 0 : i32
    %c0_i32_1 = arith.constant 0 : i32
    return %c0_i32, %c0_i32_0 : i32, i32
  }
  func.func @transform_3(%arg0: i32) -> (i32, i32) {
    %c0_i32 = arith.constant 0 : i32
    %c0_i32_0 = arith.constant 0 : i32
    %c0_i32_1 = arith.constant 0 : i32
    return %c0_i32, %c0_i32_0 : i32, i32
  }
  func.func @transform_4(%arg0: i32) -> (i32, i32) {
    %c0_i32 = arith.constant 0 : i32
    %c0_i32_0 = arith.constant 0 : i32
    %c0_i32_1 = arith.constant 0 : i32
    return %c0_i32, %c0_i32_0 : i32, i32
  }
  func.func @transform_5(%arg0: i32) -> (i32, i32) {
    %c0_i32 = arith.constant 0 : i32
    %c0_i32_0 = arith.constant 0 : i32
    %c0_i32_1 = arith.constant 0 : i32
    return %c0_i32, %c0_i32_0 : i32, i32
  }
  func.func @transform_6(%arg0: i32) -> (i32, i32) {
    %c0_i32 = arith.constant 0 : i32
    %c0_i32_0 = arith.constant 0 : i32
    %c0_i32_1 = arith.constant 0 : i32
    return %c0_i32, %c0_i32_0 : i32, i32
  }
  func.func @transform_7(%arg0: i32) -> (i32, i32) {
    %c0_i32 = arith.constant 0 : i32
    %c0_i32_0 = arith.constant 0 : i32
    return %arg0, %c0_i32 : i32, i32
  }
}

</mosaic_0001>

<bundles_post_ra>
// kernel: tpu_custom_call.1
= control target key start
LH: loop header
LB: loop body
LE: loop exit
PB: predicated region body
PF: predicated region fallthrough
CT: control target
= control target key end

     0   :  { %12 = vsyncpa [#allocation3], 0  ;;  %s516_s0 = inlined_call_operand.vmem [shape: f32[8,32], index: 0, kind: input, shape index: {}]   ;;  %s517_s1 = inlined_call_operand.vmem [shape: f32[32,32], index: 1, kind: input, shape index: {}]   ;;  %s518_s2 = inlined_call_operand.vmem [shape: f32[1,32], index: 2, kind: input, shape index: {}]   ;;  %s519_s3 = inlined_call_operand.hbm [shape: f32[32,32], index: 3, kind: input, shape index: {}]   ;;  %s520_s4 = inlined_call_operand.vmem [shape: f32[1,32], index: 4, kind: input, shape index: {}]   ;;  %s521_s5 = inlined_call_operand.vmem [shape: f32[32,16], index: 5, kind: input, shape index: {}]   ;;  %s522_s6 = inlined_call_operand.vmem [shape: f32[1,16], index: 6, kind: input, shape index: {}]   ;;  %s523_s7 = inlined_call_operand.hbm [shape: f32[8,16], index: 7, kind: output, shape index: {}]  }
   0x1   :  { %13 = vsyncpa [#allocation4], 0  ;;  %s422_s24 = smov [#allocation2]  }
   0x2   :  { %s25_s25 = sshll.u32 %s422_s24, 4  ;;  %s26_s25 = int_to_ptr.vmem [resolvable:$true] %s25_s25 }
   0x3   :  { %s386_s26 = scalar_lea.vmem %s26_s25, 512  ;;  %p391_p1 = scmp.lt.s32.totalorder %s26_s25, %s26_s25 }
   0x4   :  { %p387_p0 = scmp.ne.s32.totalorder %s26_s25, %s386_s26  ;;  %p392_p2 = scmp.lt.s32.totalorder %s386_s26, %s386_s26 }
   0x6   :  { %p393_p3 = por %p392_p2, %p391_p1 }
   0x8   :  { %p394_p4 = pnand %p393_p3, %p387_p0 }
   0xa   :  { %397 = shalt.err (!%p394_p4)
}
   0xb   :  { %s423_s27 = smov 128   ;;  %s424_s28 = smov 8  }
   0xc   :  { %31 = dma.hbm_to_vmem [thread:$0]  %s519_s3, 512, %s26_s25, [#allocation3], %s423_s27, %s423_s27, %s424_s28  }
   0xd   :  { %418 = dma.done.wait [#allocation3], 512  }
   0xe   :  { %419 = vsyncadd [#allocation3], 4294966784  ;;  %v425_v0 = vmov 0.0   ;;  %vm426_vm0 = vmmov 0   ;;  %v45_v1 = vld [vmem:[%s517_s1 + $0x18] sm:$0xff]  ;;  %v44_v2 = vld [vmem:[%s517_s1 + $0x10] sm:$0xff] }
   0xf   :  { %335 = vmatprep.subr.mxu0 %v425_v0  ;;  %343 = vmatprep.mubr.msk.f32.mxu0 %vm426_vm0, %v425_v0  ;;  %v43_v3 = vld [vmem:[%s517_s1 + $0x8] sm:$0xff]  ;;  %v42_v4 = vld [vmem:[%s517_s1] sm:$0xff]  ;;  %vm53_vm1 = vcmask 261120   ;;  %v131_v6 = vld [vmem:[#allocation2 + $0x18] sm:$0xff]  ;;  %s427_s28 = smov [#allocation5]   ;;  %vm297_vm2 = vcmask 130048  }
  0x10   :  { %346 = vmatprep.subr.mxu1 %v425_v0  ;;  %354 = vmatprep.mubr.msk.f32.mxu1 %vm426_vm0, %v425_v0  ;;  %v41_v5 = vld [vmem:[%s516_s0] sm:$0xff]  ;;  %v130_v7 = vld [vmem:[#allocation2 + $0x10] sm:$0xff]  ;;  %v129_v8 = vld [vmem:[#allocation2 + $0x8] sm:$0xff] }
  0x11   :  { %336 = vmatpush3.msra.mxu0 %v45_v1  ;;  %347 = vmatpush3.msra.mxu1 %v131_v6  ;;  %v128_v9 = vld [vmem:[#allocation2] sm:$0xff]  ;;  %v216_v15 = vld [vmem:[%s521_s5 + $0x18] sm:$0xff]  ;;  %v215_v16 = vld [vmem:[%s521_s5 + $0x10] sm:$0xff] }
  0x12   :  { %337 = vmatprep.subr.mxu0 %v425_v0  ;;  %348 = vmatprep.subr.mxu1 %v425_v0  ;;  %v314_v10 = vld [vmem:[%s518_s2] ss:$0 sm:$0xff]  ;;  %v214_v17 = vld [vmem:[%s521_s5 + $0x8] sm:$0xff] }
  0x13   :  { %338 = vmatpush3.msra.mxu0 %v44_v2  ;;  %349 = vmatpush3.msra.mxu1 %v130_v7  ;;  %v213_v18 = vld [vmem:[%s521_s5] sm:$0xff]  ;;  %s305_s5 = sshll.u32 %s427_s28, 4  ;;  %s306_s5 = int_to_ptr.vmem [resolvable:$true] %s305_s5 }
  0x14   :  { %339 = vmatprep.subr.mxu0 %v425_v0  ;;  %350 = vmatprep.subr.mxu1 %v425_v0  ;;  %v316_v19 = vld [vmem:[%s520_s4] ss:$0 sm:$0xff]  ;;  %s398_s4 = scalar_lea.vmem %s306_s5, 128  ;;  %p403_p6 = scmp.lt.s32.totalorder %s306_s5, %s306_s5 }
  0x15   :  { %340 = vmatpush3.msra.mxu0 %v43_v3  ;;  %351 = vmatpush3.msra.mxu1 %v129_v8  ;;  %v318_v24 = vld [vmem:[%s522_s6] ss:$0 sm:$0xff]  ;;  %p399_p5 = scmp.ne.s32.totalorder %s306_s5, %s398_s4  ;;  %p404_p7 = scmp.lt.s32.totalorder %s398_s4, %s398_s4 }
  0x16   :  { %341 = vmatprep.subr.mxu0 %v425_v0  ;;  %352 = vmatprep.subr.mxu1 %v425_v0 }
  0x17   :  { %342 = vmatpush3.msra.mxu0 %v42_v4  ;;  %353 = vmatpush3.msra.mxu1 %v128_v9  ;;  %p405_p8 = por %p404_p7, %p403_p6 }
  0x18   :  { %344 = vmatmul.mubr.msk.f32.vlgmr.msra.gmra.mxu0 %vm53_vm1, %v41_v5  ;;  %357 = vmatprep.subr.mxu0 %v425_v0 }
  0x19   :  { %365 = vmatprep.mubr.msk.f32.mxu0 %vm426_vm0, %v425_v0  ;;  %358 = vmatpush3.msra.mxu0 %v216_v15  ;;  %p406_p9 = pnand %p405_p8, %p399_p5 }
  0x1a   :  { %359 = vmatprep.subr.mxu0 %v425_v0 }
  0x1b   :  { %360 = vmatpush3.msra.mxu0 %v215_v16 }
  0x1c   :  { %361 = vmatprep.subr.mxu0 %v425_v0 }
  0x1d   :  { %362 = vmatpush3.msra.mxu0 %v214_v17 }
  0x1e   :  { %363 = vmatprep.subr.mxu0 %v425_v0 }
  0x1f   :  { %364 = vmatpush3.msra.mxu0 %v213_v18 }
  0xd8   :  { %v123_v11 = vpop.f32.mrf.mxu0 }
  0xd9   :  { %v124_v12 = vadd.f32 %v314_v10, %v123_v11 }
  0xda   :  { %v345_v13 = vpop.f32.mrf.mxu0 }
  0xdb   :  { %374 = vtanh.f32 %v124_v12 }
  0xe8   :  { %v375_v14 = vpop.eup %374 }
  0xe9   :  { %355 = vmatmul.mubr.msk.f32.vlgmr.msra.gmra.mxu1 %vm53_vm1, %v375_v14 }
 0x1a9   :  { %v208_v20 = vpop.f32.mrf.mxu1 }
 0x1aa   :  { %v209_v21 = vadd.f32 %v316_v19, %v208_v20 }
 0x1ab   :  { %v356_v22 = vpop.f32.mrf.mxu1 }
 0x1ac   :  { %376 = vtanh.f32 %v209_v21 }
 0x1b9   :  { %v377_v23 = vpop.eup %376 }
 0x1ba   :  { %366 = vmatmul.mubr.msk.f32.vlgmr.msra.gmra.mxu0 %vm53_vm1, %v377_v23 }
 0x27a   :  { %v293_v25 = vpop.f32.mrf.mxu0 }
 0x27b   :  { %v294_v26 = vadd.f32 %v318_v24, %v293_v25 }
 0x27c   :  { %v367_v27 = vpop.f32.mrf.mxu0 }
 0x27d   :  { %298 = vst.msk [vmem:[#allocation5] sm:$0xff] %vm297_vm2, %v294_v26 }
 0x27e   :  { %409 = shalt.err (!%p406_p9)
}
 0x27f   :  { %308 = dma.vmem_to_hbm [thread:$0]  %s306_s5, 128, %s523_s7, [#allocation4]  }
 0x280   :  { %420 = dma.done.wait [#allocation4], 128  }
 0x281   :  { %421 = vsyncadd [#allocation4], 4294967168 }
 0x282   :  { %312 = vsyncpa [#allocation3], 1 }
 0x283   :  { %313 = vsyncpa [#allocation4], 1 }

</bundles_post_ra>
